<compile_context>
chip_gen: v7x
topology: tpu7x:2x2x1
jax: 0.10.0
libtpu: 0.0.40
codegen_flags: <defaults>
</compile_context>

<pallas_src>
import numpy as np
import jax
import jax.numpy as jnp
from jax.experimental import pallas as pl
from jax.experimental.pallas import tpu as pltpu


def _round_up(x, m):
    return ((x + m - 1) // m) * m


# ---------------------------------------------------------------------------
# Pallas kernels
# ---------------------------------------------------------------------------
def _gemm_bias_kernel(a_ref, b_ref, c_ref, o_ref):
    acc = jnp.dot(a_ref[...], b_ref[...], preferred_element_type=jnp.float32)
    o_ref[...] = acc + c_ref[...]


def _gemm_bias_relu_kernel(a_ref, b_ref, c_ref, o_ref):
    acc = jnp.dot(a_ref[...], b_ref[...], preferred_element_type=jnp.float32)
    o_ref[...] = jnp.maximum(acc + c_ref[...], 0.0)


def _gemm_bias_res_relu_kernel(a_ref, b_ref, c_ref, r_ref, o_ref):
    acc = jnp.dot(a_ref[...], b_ref[...], preferred_element_type=jnp.float32)
    o_ref[...] = jnp.maximum(acc + c_ref[...] + r_ref[...], 0.0)


def _max9_kernel(x_ref, o_ref):
    # x_ref: [9, R, lane] -> elementwise max over the 9 pooling-window taps
    o_ref[...] = jnp.max(x_ref[...], axis=0)


def _adaptive_pool_kernel(p_ref, x_ref, o_ref):
    # p_ref: [196, H*W] pooling matrix, x_ref: [1, H*W, C] one batch image
    o_ref[0] = jnp.dot(p_ref[...], x_ref[0], preferred_element_type=jnp.float32)


# ---------------------------------------------------------------------------
# GEMM wrapper: out = act((A @ B) + bias [+ residual])
# ---------------------------------------------------------------------------
def gemm_bias_act(a, b_bf16, bias, *, relu, residual=None):
    M, K = a.shape
    K2, N = b_bf16.shape
    assert K == K2
    tm = min(128, _round_up(M, 8))
    Mp = _round_up(M, tm)
    tn = 128 if (N > 128 and N % 128 == 0) else N

    a_p = a if Mp == M else jnp.pad(a, ((0, Mp - M), (0, 0)))
    a_p = a_p.astype(jnp.bfloat16)
    bias2 = bias.reshape(1, N).astype(jnp.float32)

    in_specs = [
        pl.BlockSpec((tm, K), lambda i, j: (i, 0)),
        pl.BlockSpec((K, tn), lambda i, j: (0, j)),
        pl.BlockSpec((1, tn), lambda i, j: (0, j)),
    ]
    args = [a_p, b_bf16, bias2]
    if residual is None:
        kernel = _gemm_bias_relu_kernel if relu else _gemm_bias_kernel
    else:
        assert relu
        r = residual if Mp == M else jnp.pad(residual, ((0, Mp - M), (0, 0)))
        in_specs.append(pl.BlockSpec((tm, tn), lambda i, j: (i, j)))
        args.append(r.astype(jnp.float32))
        kernel = _gemm_bias_res_relu_kernel

    out = pl.pallas_call(
        kernel,
        out_shape=jax.ShapeDtypeStruct((Mp, N), jnp.float32),
        grid=(Mp // tm, N // tn),
        in_specs=in_specs,
        out_specs=pl.BlockSpec((tm, tn), lambda i, j: (i, j)),
        compiler_params=pltpu.CompilerParams(
            dimension_semantics=("parallel", "parallel"),
        ),
    )(*args)
    return out if Mp == M else out[:M]


# ---------------------------------------------------------------------------
# Conv (NHWC im2col + Pallas GEMM, BN folded into weights, fused residual/ReLU)
# ---------------------------------------------------------------------------
def im2col_nhwc(x, kh, kw, stride, pad):
    B, H, W, C = x.shape
    Ho = (H + 2 * pad - kh) // stride + 1
    Wo = (W + 2 * pad - kw) // stride + 1
    xp = jnp.pad(x, ((0, 0), (pad, pad), (pad, pad), (0, 0))) if pad > 0 else x
    cols = []
    for i in range(kh):
        for j in range(kw):
            cols.append(xp[:, i::stride, j::stride, :][:, :Ho, :Wo, :])
    patches = cols[0] if len(cols) == 1 else jnp.concatenate(cols, axis=-1)
    return patches.reshape(B * Ho * Wo, kh * kw * C), Ho, Wo


def conv_bn(x, w, scale, shift, *, stride, pad, relu, residual=None):
    """NHWC conv + folded-BN affine (+ fused residual add) (+ ReLU)."""
    OC, C, kh, kw = w.shape
    B = x.shape[0]
    patches, Ho, Wo = im2col_nhwc(x, kh, kw, stride, pad)
    # fold BN scale into weight columns; K ordering (kh, kw, C) matches im2col order
    wm = (w.transpose(2, 3, 1, 0).reshape(kh * kw * C, OC) * scale[None, :])
    wm = wm.astype(jnp.bfloat16)
    res_flat = None if residual is None else residual.reshape(B * Ho * Wo, OC)
    out = gemm_bias_act(patches, wm, shift, relu=relu, residual=res_flat)
    return out.reshape(B, Ho, Wo, OC)


# ---------------------------------------------------------------------------
# MaxPool2d(kernel_size=3, stride=2, padding=1) on NHWC, lane-dense reduction
# ---------------------------------------------------------------------------
def maxpool3x3s2(x):
    B, H, W, C = x.shape
    Ho = (H + 2 - 3) // 2 + 1
    Wo = (W + 2 - 3) // 2 + 1
    xp = jnp.pad(x, ((0, 0), (1, 1), (1, 1), (0, 0)), constant_values=-jnp.inf)
    taps = [xp[:, i::2, j::2, :][:, :Ho, :Wo, :] for i in range(3) for j in range(3)]
    stk = jnp.stack(taps, axis=0).reshape(9, -1)
    S = stk.shape[1]
    lane = 128 if S % 128 == 0 else C     # lane-dense flattening
    stk = stk.reshape(9, S // lane, lane)
    out = pl.pallas_call(
        _max9_kernel,
        out_shape=jax.ShapeDtypeStruct((S // lane, lane), jnp.float32),
    )(stk)
    return out.reshape(B, Ho, Wo, C)


# ---------------------------------------------------------------------------
# AdaptiveAvgPool2d((14,14)) (exact PyTorch semantics) as one tiny per-batch GEMM
# output is already [B, 14, 14, C] == out.permute(0, 2, 3, 1)
# ---------------------------------------------------------------------------
def adaptive_pool_matrix(in_size, out_size):
    mat = np.zeros((out_size, in_size), np.float32)
    for i in range(out_size):
        start = (i * in_size) // out_size
        end = ((i + 1) * in_size + out_size - 1) // out_size
        mat[i, start:end] = 1.0 / (end - start)
    return mat


def adaptive_avg_pool(x, out_hw=14):
    B, H, W, C = x.shape
    Ph = adaptive_pool_matrix(H, out_hw)
    Pw = adaptive_pool_matrix(W, out_hw)
    P2 = jnp.asarray(
        np.einsum("ih,jw->ijhw", Ph, Pw).reshape(out_hw * out_hw, H * W),
        jnp.float32)
    xr = x.reshape(B, H * W, C)
    P = out_hw * out_hw
    out = pl.pallas_call(
        _adaptive_pool_kernel,
        out_shape=jax.ShapeDtypeStruct((B, P, C), jnp.float32),
        grid=(B,),
        in_specs=[
            pl.BlockSpec((P, H * W), lambda b: (0, 0)),
            pl.BlockSpec((1, H * W, C), lambda b: (b, 0, 0)),
        ],
        out_specs=pl.BlockSpec((1, P, C), lambda b: (b, 0, 0)),
        compiler_params=pltpu.CompilerParams(dimension_semantics=("parallel",)),
    )(P2, xr)
    return out.reshape(B, out_hw, out_hw, C)


# ---------------------------------------------------------------------------
# Parameter construction (deterministic, ResNet-34 topology)
# ---------------------------------------------------------------------------
def bn_fold(gamma, beta, mean, var, eps=1e-5):
    scale = gamma / jnp.sqrt(var + eps)
    shift = beta - mean * scale
    return scale, shift


def init_conv(key, oc, ic, kh, kw):
    fan_in = ic * kh * kw
    return jax.random.normal(key, (oc, ic, kh, kw), jnp.float32) * (2.0 / fan_in) ** 0.5


def init_bn(key, c):
    k1, k2 = jax.random.split(key)
    gamma = 1.0 + 0.1 * jax.random.normal(k1, (c,), jnp.float32)
    beta = 0.1 * jax.random.normal(k2, (c,), jnp.float32)
    mean = jnp.zeros((c,), jnp.float32)
    var = jnp.ones((c,), jnp.float32)
    return bn_fold(gamma, beta, mean, var)


def make_params(key):
    keys = iter(jax.random.split(key, 128))
    params = {
        "stem_w": init_conv(next(keys), 64, 3, 7, 7),
        "stem_bn": init_bn(next(keys), 64),
        "blocks": [],
    }
    # ResNet-34 stage config: (channels, num_blocks, first_stride)
    cfg = [(64, 3, 1), (128, 4, 2), (256, 6, 2), (512, 3, 2)]
    in_c = 64
    for (c, n, s) in cfg:
        for b in range(n):
            stride = s if b == 0 else 1
            blk = {
                "w1": init_conv(next(keys), c, in_c, 3, 3),
                "bn1": init_bn(next(keys), c),
                "w2": init_conv(next(keys), c, c, 3, 3),
                "bn2": init_bn(next(keys), c),
                "stride": stride,
            }
            if stride != 1 or in_c != c:
                blk["wd"] = init_conv(next(keys), c, in_c, 1, 1)
                blk["bnd"] = init_bn(next(keys), c)
            params["blocks"].append(blk)
            in_c = c
    return params


# ---------------------------------------------------------------------------
# Encoder forward (= resnet34 children[:-2] -> AdaptiveAvgPool2d((14,14)) -> permute)
# ---------------------------------------------------------------------------
def encoder_forward(params, image_batch):
    # NCHW input (PyTorch convention) -> NHWC once; everything stays NHWC after this.
    x = jnp.transpose(image_batch, (0, 2, 3, 1)).astype(jnp.float32)
    sc, sh = params["stem_bn"]
    out = conv_bn(x, params["stem_w"], sc, sh, stride=2, pad=3, relu=True)
    out = maxpool3x3s2(out)
    for blk in params["blocks"]:
        s1, b1 = blk["bn1"]
        s2, b2 = blk["bn2"]
        if "wd" in blk:
            sd, bd = blk["bnd"]
            identity = conv_bn(out, blk["wd"], sd, bd,
                               stride=blk["stride"], pad=0, relu=False)
        else:
            identity = out
        y = conv_bn(out, blk["w1"], s1, b1, stride=blk["stride"], pad=1, relu=True)
        # residual add + ReLU fused into the 2nd conv's GEMM epilogue
        out = conv_bn(y, blk["w2"], s2, b2, stride=1, pad=1,
                      relu=True, residual=identity)
    out = adaptive_avg_pool(out, 14)   # NHWC == permute(0, 2, 3, 1) of the NCHW result
    return out


if __name__ == "__main__":
    key = jax.random.PRNGKey(0)
    pkey, xkey = jax.random.split(key)
    params = make_params(pkey)
    # small input consistent with the module: NCHW image batch
    x = jax.random.normal(xkey, (2, 3, 64, 64), jnp.float32)
    out = encoder_forward(params, x)
    out = jax.block_until_ready(out)
    assert out.shape == (2, 14, 14, 512), out.shape
    assert bool(jnp.all(jnp.isfinite(out)))
    print("KERNEL_OK")
</pallas_src>

<mosaic_0001>
module attributes {stable_mosaic.version = 11 : i64} {
  func.func @_gemm_bias_relu_kernel(%arg0: i32, %arg1: i32, %arg2: memref<128x147xbf16, #tpu.memory_space<vmem>>, %arg3: memref<147x64xbf16, #tpu.memory_space<vmem>>, %arg4: memref<1x64xf32, #tpu.memory_space<vmem>>, %arg5: memref<128x64xf32, #tpu.memory_space<vmem>>) attributes {dimension_semantics = [#tpu.dimension_semantics<parallel>, #tpu.dimension_semantics<parallel>], iteration_bounds = array<i64: 16, 1>, scalar_prefetch = 0 : i64, scratch_operands = 0 : i64, tpu.core_type = #tpu.core_type<tc>, window_params = [{transform_indices = @transform_0, window_bounds = array<i64: 128, 147>}, {transform_indices = @transform_1, window_bounds = array<i64: 147, 64>}, {transform_indices = @transform_2, window_bounds = array<i64: 1, 64>}, {transform_indices = @transform_3, window_bounds = array<i64: 128, 64>}]} {
    %c0 = arith.constant 0 : index
    %c0_0 = arith.constant 0 : index
    %0 = vector.load %arg2[%c0, %c0_0] : memref<128x147xbf16, #tpu.memory_space<vmem>>, vector<128x147xbf16>
    %c0_1 = arith.constant 0 : index
    %c0_2 = arith.constant 0 : index
    %1 = vector.load %arg3[%c0_1, %c0_2] : memref<147x64xbf16, #tpu.memory_space<vmem>>, vector<147x64xbf16>
    %cst = arith.constant dense<0.000000e+00> : vector<128x64xf32>
    %2 = tpu.matmul %0, %1, %cst {dimension_numbers = #tpu.dot_dimension_numbers<[1], [0], [0], [1], [0, 0, 1, 1], [], []>} : vector<128x147xbf16>, vector<147x64xbf16>, vector<128x64xf32> -> vector<128x64xf32>
    %c0_3 = arith.constant 0 : index
    %c0_4 = arith.constant 0 : index
    %3 = vector.load %arg4[%c0_3, %c0_4] : memref<1x64xf32, #tpu.memory_space<vmem>>, vector<1x64xf32>
    %4 = vector.broadcast %3 : vector<1x64xf32> to vector<128x64xf32>
    %5 = arith.addf %2, %4 : vector<128x64xf32>
    %cst_5 = arith.constant 0.000000e+00 : f32
    %6 = vector.broadcast %cst_5 : f32 to vector<128x64xf32>
    %7 = arith.maximumf %5, %6 : vector<128x64xf32>
    %c0_6 = arith.constant 0 : index
    %c0_7 = arith.constant 0 : index
    %8 = vector.load %arg5[%c0_6, %c0_7] : memref<128x64xf32, #tpu.memory_space<vmem>>, vector<128x64xf32>
    tpu.vector_store %arg5[%c0_6, %c0_7], %7 {strides = array<i32>} : memref<128x64xf32, #tpu.memory_space<vmem>>, vector<128x64xf32>,
    return
  }
  func.func @transform_0(%arg0: i32, %arg1: i32) -> (i32, i32) {
    %c0_i32 = arith.constant 0 : i32
    %c0_i32_0 = arith.constant 0 : i32
    return %arg0, %c0_i32 : i32, i32
  }
  func.func @transform_1(%arg0: i32, %arg1: i32) -> (i32, i32) {
    %c0_i32 = arith.constant 0 : i32
    %c0_i32_0 = arith.constant 0 : i32
    return %c0_i32, %arg1 : i32, i32
  }
  func.func @transform_2(%arg0: i32, %arg1: i32) -> (i32, i32) {
    %c0_i32 = arith.constant 0 : i32
    %c0_i32_0 = arith.constant 0 : i32
    return %c0_i32, %arg1 : i32, i32
  }
  func.func @transform_3(%arg0: i32, %arg1: i32) -> (i32, i32) {
    %c0_i32 = arith.constant 0 : i32
    return %arg0, %arg1 : i32, i32
  }
}

</mosaic_0001>

<bundles_post_ra>
// kernel: tpu_custom_call.1
= control target key start
LH: loop header
LB: loop body
LE: loop exit
PB: predicated region body
PF: predicated region fallthrough
CT: control target
= control target key end

     0   :  { %s840_s12 = smov 0   ;;  %s842_s13 = smov 0   ;;  %s991_s0 = inlined_call_operand.vmem [shape: bf16[2048,147], index: 0, kind: input, shape index: {}]   ;;  %s992_s1 = inlined_call_operand.vmem [shape: bf16[147,64], index: 1, kind: input, shape index: {}]   ;;  %s993_s2 = inlined_call_operand.vmem [shape: f32[1,64], index: 2, kind: input, shape index: {}]   ;;  %s994_s3 = inlined_call_operand.vmem [shape: f32[2048,64], index: 3, kind: output, shape index: {}]  }
   0x1   :  { %s844_s14 = smov 0  }
   0x2 LB: > { %s25_s15 = sadd.s32 1, %s812_s13  ;;  %p670_p0 = scmp.ge.s32.totalorder %s816_s14, 1  ;;  %s816_s14 = sphi %s844_s14, %s13_s14   ;;  %s812_s13 = sphi %s842_s13, %s996_s13   ;;  %s808_s12 = sphi %s840_s12, %s995_s12  }
   0x3   : > { %p27_p1 = scmp.ge.s32.totalorder %s25_s15, 16  ;;  %p170_p2 = scmp.lt.s32.totalorder %s816_s14, 17 }
   0x5   : > { %s998_s15 = smov (%p27_p1, %s25_s15), 0  ;;  %p171_p3 = pnand %p670_p0, %p170_p2 }
   0x6   : > { %v760_v0 = vld [vmem:[%s992_s1] sm:$0xff] (!%p171_p3)   ;;  %v818_v1 = vmov (!%p171_p3), 0   ;;  %v761_v2 = vld [vmem:[%s992_s1 + $0x8] sm:$0xff] (!%p171_p3)   ;;  %v762_v3 = vld [vmem:[%s992_s1 + $0x10] sm:$0xff] (!%p171_p3)   ;;  %s671_s22 = sshll.u32 (!%p171_p3), %s808_s12, 4  ;;  %vm400_vm0 = vcmask (!%p171_p3), 154624  }
   0x7   : > { %174 = sbr.rel (%p171_p3) target bundleno = 290 (0x122), region = 32  ;;  %432 = vmatprep.subr.bf16.mxu0 (!%p171_p3), %v818_v1  ;;  %714 = vmatprep.subr.bf16.mxu1 (!%p171_p3), %v818_v1  ;;  %p206_p4 = scmp.lt.s32.totalorder (!%p171_p3), %s671_s22, 255  ;;  %v763_v4 = vld [vmem:[%s992_s1 + $0x18] sm:$0xff] (!%p171_p3)   ;;  %v764_v5 = vld [vmem:[%s992_s1 + $0x20] sm:$0xff] (!%p171_p3)   ;;  %v765_v8 = vld [vmem:[%s992_s1 + $0x28] sm:$0xff] (!%p171_p3)   ;;  %vm425_vm1 = vcmask (!%p171_p3), 1040384  }
   0x8   : > { %433 = vmatpush1.bf16.msra.mxu0 (!%p171_p3), %v760_v0  ;;  %724 = vmatpush1.bf16.msra.mxu1 (!%p171_p3), %v760_v0  ;;  %v766_v9 = vld [vmem:[%s992_s1 + $0x30] sm:$0xff] (!%p171_p3)   ;;  %v767_v10 = vld [vmem:[%s992_s1 + $0x38] sm:$0xff] (!%p171_p3)   ;;  %vm426_vm2 = vcmask (!%p171_p3), 1041408   ;;  %v819_v11 = vmov (!%p171_p3), 65535   ;;  %v768_v13 = vld [vmem:[%s992_s1 + $0x40] sm:$0xff] (!%p171_p3)   ;;  %vm545_vm3 = vcmask (!%p171_p3), 523264  }
   0x9   : > { %434 = vmatprep.subr.bf16.mxu0 (!%p171_p3), %v818_v1  ;;  %715 = vmatprep.subr.bf16.mxu1 (!%p171_p3), %v818_v1  ;;  %v427_v12 = vsel (!%p171_p3), %vm425_vm1, 4294967295, %v819_v11  ;;  %v769_v14 = vld [vmem:[%s992_s1 + $0x48] ss:$0 sps:$4 sm:$0x33] (!%p171_p3)   ;;  %v925_v31 = vld [vmem:[%s993_s2] ss:$0 sm:$0xff] (!%p171_p3) }
   0xa   : > { %v428_v15 = vsel (!%p171_p3), %vm426_vm2, %v427_v12, 0 }
   0xb   : > { %v430_v16 = vand.u32 (!%p171_p3), %v769_v14, %v428_v15 }
   0xc   : > { %435 = vmatpush1.bf16.msra.mxu0 (!%p171_p3), %v761_v2  ;;  %725 = vmatpush1.bf16.msra.mxu1 (!%p171_p3), %v761_v2 }
   0xd   : > { %436 = vmatprep.subr.bf16.mxu0 (!%p171_p3), %v818_v1  ;;  %716 = vmatprep.subr.bf16.mxu1 (!%p171_p3), %v818_v1 }
   0xe   : > { %s1000_s22 = smov (!%p206_p4, %s671_s22), 255 }
   0xf   : > { %s713_s25 = sshll.u32 %s1000_s22, 3 }
  0x10   : > { %437 = vmatpush1.bf16.msra.mxu0 %v762_v3  ;;  %726 = vmatpush1.bf16.msra.mxu1 %v762_v3  ;;  %s878_s28 = scalar_lea.vmem %s991_s0, %s713_s25  ;;  %s934_s21 = scalar_lea.vmem %s994_s3, %s713_s25 }
  0x11   : > { %438 = vmatprep.subr.bf16.mxu0 %v818_v1  ;;  %717 = vmatprep.subr.bf16.mxu1 %v818_v1  ;;  %v772_v6 = vld [vmem:[%s878_s28 + $0x4] ss:$8 sps:$4 sm:$0xff]   ;;  %v770_v17 = vld [vmem:[%s878_s28] ss:$8 sps:$4 sm:$0xff]   ;;  %v776_v19 = vld [vmem:[%s878_s28 + $0x14] ss:$8 sps:$4 sm:$0xff]  }
  0x12   : > { %v775_v7 = vld [vmem:[%s878_s28 + $0x44] ss:$8 sps:$4 sm:$0xff]   ;;  %703 = vmatprep.mubr.msk.bf16.mxu0 %vm400_vm0, %v772_v6  ;;  %v773_v18 = vld [vmem:[%s878_s28 + $0x40] ss:$8 sps:$4 sm:$0xff]   ;;  %v778_v20 = vld [vmem:[%s878_s28 + $0x54] ss:$8 sps:$4 sm:$0xff]  }
  0x13   : > { %707 = vmatprep.mubr.msk.bf16.mxu1 %vm400_vm0, %v775_v7  ;;  %v780_v21 = vld [vmem:[%s878_s28 + $0x10] ss:$8 sps:$4 sm:$0xff]   ;;  %v782_v23 = vld [vmem:[%s878_s28 + $0x24] ss:$8 sps:$4 sm:$0xff]   ;;  %v786_v25 = vld [vmem:[%s878_s28 + $0x20] ss:$8 sps:$4 sm:$0xff]  }
  0x14   : > { %439 = vmatpush1.bf16.msra.mxu0 %v763_v4  ;;  %727 = vmatpush1.bf16.msra.mxu1 %v763_v4  ;;  %v781_v22 = vld [vmem:[%s878_s28 + $0x50] ss:$8 sps:$4 sm:$0xff]   ;;  %v784_v24 = vld [vmem:[%s878_s28 + $0x64] ss:$8 sps:$4 sm:$0xff]   ;;  %v787_v26 = vld [vmem:[%s878_s28 + $0x60] ss:$8 sps:$4 sm:$0xff]  }
  0x15   : > { %440 = vmatprep.subr.bf16.mxu0 %v818_v1  ;;  %718 = vmatprep.subr.bf16.mxu1 %v818_v1  ;;  %v788_v27 = vld [vmem:[%s878_s28 + $0x34] ss:$8 sps:$4 sm:$0xff]   ;;  %v792_v29 = vld [vmem:[%s878_s28 + $0x30] ss:$8 sps:$4 sm:$0xff]  }
  0x16   : > { %v790_v28 = vld [vmem:[%s878_s28 + $0x74] ss:$8 sps:$4 sm:$0xff]   ;;  %v793_v30 = vld [vmem:[%s878_s28 + $0x70] ss:$8 sps:$4 sm:$0xff]  }
  0x18   : > { %441 = vmatpush1.bf16.msra.mxu0 %v764_v5  ;;  %728 = vmatpush1.bf16.msra.mxu1 %v764_v5 }
  0x19   : > { %442 = vmatprep.subr.bf16.mxu0 %v818_v1  ;;  %719 = vmatprep.subr.bf16.mxu1 %v818_v1 }
  0x1c   : > { %443 = vmatpush1.bf16.msra.mxu0 %v765_v8  ;;  %729 = vmatpush1.bf16.msra.mxu1 %v765_v8 }
  0x1d   : > { %444 = vmatprep.subr.bf16.mxu0 %v818_v1  ;;  %720 = vmatprep.subr.bf16.mxu1 %v818_v1 }
  0x20   : > { %445 = vmatpush1.bf16.msra.mxu0 %v766_v9  ;;  %730 = vmatpush1.bf16.msra.mxu1 %v766_v9 }
  0x21   : > { %446 = vmatprep.subr.bf16.mxu0 %v818_v1  ;;  %721 = vmatprep.subr.bf16.mxu1 %v818_v1 }
  0x24   : > { %447 = vmatpush1.bf16.msra.mxu0 %v767_v10  ;;  %731 = vmatpush1.bf16.msra.mxu1 %v767_v10 }
  0x25   : > { %448 = vmatprep.subr.bf16.mxu0 %v818_v1  ;;  %722 = vmatprep.subr.bf16.mxu1 %v818_v1 }
  0x28   : > { %449 = vmatpush1.bf16.msra.mxu0 %v768_v13  ;;  %732 = vmatpush1.bf16.msra.mxu1 %v768_v13 }
  0x29   : > { %450 = vmatprep.subr.bf16.mxu0 %v818_v1  ;;  %723 = vmatprep.subr.bf16.mxu1 %v818_v1 }
  0x2c   : > { %451 = vmatpush1.bf16.msra.mxu0 %v430_v16  ;;  %733 = vmatpush1.bf16.msra.mxu1 %v430_v16 }
  0x2f   : > { %465 = vmatmul.mubr.bf16.vlgmr.msra.gmra.mrb[0].mxu0 %v770_v17  ;;  %497 = vmatmul.mubr.bf16.vlgmr.msra.gmra.mrb[0].mxu1 %v773_v18 }
  0x30   : > { %704 = vmatprep.mubr.msk.bf16.mxu0 %vm400_vm0, %v776_v19  ;;  %708 = vmatprep.mubr.msk.bf16.mxu1 %vm400_vm0, %v778_v20 }
  0x37   : > { %473 = vmatmul.mubr.bf16.gmra.mrb[4].mxu0 %v780_v21  ;;  %505 = vmatmul.mubr.bf16.gmra.mrb[4].mxu1 %v781_v22 }
  0x38   : > { %705 = vmatprep.mubr.msk.bf16.mxu0 %vm400_vm0, %v782_v23  ;;  %709 = vmatprep.mubr.msk.bf16.mxu1 %vm400_vm0, %v784_v24 }
  0x3f   : > { %481 = vmatmul.mubr.bf16.gmra.mrb[8].mxu0 %v786_v25  ;;  %513 = vmatmul.mubr.bf16.gmra.mrb[8].mxu1 %v787_v26 }
  0x40   : > { %706 = vmatprep.mubr.msk.bf16.mxu0 %vm400_vm0, %v788_v27  ;;  %710 = vmatprep.mubr.msk.bf16.mxu1 %vm400_vm0, %v790_v28 }
  0x47   : > { %489 = vmatmul.mubr.bf16.gmra.mrb[12].mxu0 %v792_v29  ;;  %521 = vmatmul.mubr.bf16.gmra.mrb[12].mxu1 %v793_v30 }
 0x102   : > { %v466_v32 = vpop.f32.mrb[0].mxu0  ;;  %v498_v33 = vpop.f32.mrb[0].mxu1 }
 0x103   : > { %v467_v34 = vadd.f32 %v925_v31, %v466_v32  ;;  %v499_v35 = vadd.f32 %v925_v31, %v498_v33  ;;  %v468_v36 = vpop.f32.mrb[1].mxu0  ;;  %v500_v37 = vpop.f32.mrb[1].mxu1 }
 0x104   : > { %v469_v38 = vpop.f32.mrb[2].mxu0  ;;  %v501_v39 = vpop.f32.mrb[2].mxu1 }
 0x105   : > { %v529_v40 = vmax.f32 %v467_v34, 0.0  ;;  %v537_v41 = vmax.f32 %v499_v35, 0.0  ;;  %v470_v42 = vadd.f32 %v925_v31, %v469_v38  ;;  %v502_v43 = vadd.f32 %v925_v31, %v501_v39  ;;  %v471_v44 = vpop.f32.mrb[3].mxu0  ;;  %v503_v45 = vpop.f32.mrb[3].mxu1 }
 0x107   : > { %546 = vst.msk [vmem:[%s934_s21] sm:$0xff] %vm545_vm3, %v529_v40  ;;  %554 = vst.msk [vmem:[%s934_s21 + $0x40] sm:$0xff] %vm545_vm3, %v537_v41  ;;  %v530_v46 = vmax.f32 %v470_v42, 0.0  ;;  %v538_v47 = vmax.f32 %v502_v43, 0.0 }
 0x109   : > { %547 = vst.msk [vmem:[%s934_s21 + $0x8] sm:$0xff] %vm545_vm3, %v530_v46  ;;  %555 = vst.msk [vmem:[%s934_s21 + $0x48] sm:$0xff] %vm545_vm3, %v538_v47 }
 0x10a   : > { %v474_v48 = vpop.f32.mrb[4].mxu0  ;;  %v506_v49 = vpop.f32.mrb[4].mxu1 }
 0x10b   : > { %v475_v50 = vadd.f32 %v925_v31, %v474_v48  ;;  %v507_v51 = vadd.f32 %v925_v31, %v506_v49  ;;  %v476_v52 = vpop.f32.mrb[5].mxu0  ;;  %v508_v53 = vpop.f32.mrb[5].mxu1 }
 0x10c   : > { %v477_v54 = vpop.f32.mrb[6].mxu0  ;;  %v509_v55 = vpop.f32.mrb[6].mxu1 }
 0x10d   : > { %v531_v56 = vmax.f32 %v475_v50, 0.0  ;;  %v539_v57 = vmax.f32 %v507_v51, 0.0  ;;  %v478_v58 = vadd.f32 %v925_v31, %v477_v54  ;;  %v510_v59 = vadd.f32 %v925_v31, %v509_v55  ;;  %v479_v60 = vpop.f32.mrb[7].mxu0  ;;  %v511_v61 = vpop.f32.mrb[7].mxu1 }
 0x10f   : > { %548 = vst.msk [vmem:[%s934_s21 + $0x10] sm:$0xff] %vm545_vm3, %v531_v56  ;;  %556 = vst.msk [vmem:[%s934_s21 + $0x50] sm:$0xff] %vm545_vm3, %v539_v57  ;;  %v532_v62 = vmax.f32 %v478_v58, 0.0  ;;  %v540_v63 = vmax.f32 %v510_v59, 0.0 }
 0x111   : > { %549 = vst.msk [vmem:[%s934_s21 + $0x18] sm:$0xff] %vm545_vm3, %v532_v62  ;;  %557 = vst.msk [vmem:[%s934_s21 + $0x58] sm:$0xff] %vm545_vm3, %v540_v63 }
 0x112   : > { %v482_v0 = vpop.f32.mrb[8].mxu0  ;;  %v514_v1 = vpop.f32.mrb[8].mxu1 }
 0x113   : > { %v483_v2 = vadd.f32 %v925_v31, %v482_v0  ;;  %v515_v3 = vadd.f32 %v925_v31, %v514_v1  ;;  %v484_v4 = vpop.f32.mrb[9].mxu0  ;;  %v516_v5 = vpop.f32.mrb[9].mxu1 }
 0x114   : > { %v485_v6 = vpop.f32.mrb[10].mxu0  ;;  %v517_v7 = vpop.f32.mrb[10].mxu1 }
 0x115   : > { %v533_v8 = vmax.f32 %v483_v2, 0.0  ;;  %v541_v9 = vmax.f32 %v515_v3, 0.0  ;;  %v486_v10 = vadd.f32 %v925_v31, %v485_v6  ;;  %v518_v11 = vadd.f32 %v925_v31, %v517_v7  ;;  %v487_v12 = vpop.f32.mrb[11].mxu0  ;;  %v519_v13 = vpop.f32.mrb[11].mxu1 }
 0x117   : > { %550 = vst.msk [vmem:[%s934_s21 + $0x20] sm:$0xff] %vm545_vm3, %v533_v8  ;;  %558 = vst.msk [vmem:[%s934_s21 + $0x60] sm:$0xff] %vm545_vm3, %v541_v9  ;;  %v534_v14 = vmax.f32 %v486_v10, 0.0  ;;  %v542_v15 = vmax.f32 %v518_v11, 0.0 }
 0x119   : > { %551 = vst.msk [vmem:[%s934_s21 + $0x28] sm:$0xff] %vm545_vm3, %v534_v14  ;;  %559 = vst.msk [vmem:[%s934_s21 + $0x68] sm:$0xff] %vm545_vm3, %v542_v15 }
 0x11a   : > { %v490_v16 = vpop.f32.mrb[12].mxu0  ;;  %v522_v17 = vpop.f32.mrb[12].mxu1 }
 0x11b   : > { %v491_v18 = vadd.f32 %v925_v31, %v490_v16  ;;  %v523_v19 = vadd.f32 %v925_v31, %v522_v17  ;;  %v492_v20 = vpop.f32.mrb[13].mxu0  ;;  %v524_v21 = vpop.f32.mrb[13].mxu1 }
 0x11c   : > { %v493_v22 = vpop.f32.mrb[14].mxu0  ;;  %v525_v23 = vpop.f32.mrb[14].mxu1 }
 0x11d   : > { %v535_v24 = vmax.f32 %v491_v18, 0.0  ;;  %v543_v25 = vmax.f32 %v523_v19, 0.0  ;;  %v494_v26 = vadd.f32 %v925_v31, %v493_v22  ;;  %v526_v27 = vadd.f32 %v925_v31, %v525_v23  ;;  %v495_v28 = vpop.f32.mrb[15].mxu0  ;;  %v527_v29 = vpop.f32.mrb[15].mxu1 }
 0x11f   : > { %552 = vst.msk [vmem:[%s934_s21 + $0x30] sm:$0xff] %vm545_vm3, %v535_v24  ;;  %560 = vst.msk [vmem:[%s934_s21 + $0x70] sm:$0xff] %vm545_vm3, %v543_v25  ;;  %v536_v30 = vmax.f32 %v494_v26, 0.0  ;;  %v544_v32 = vmax.f32 %v526_v27, 0.0 }
 0x121   : > { %553 = vst.msk [vmem:[%s934_s21 + $0x38] sm:$0xff] %vm545_vm3, %v536_v30  ;;  %561 = vst.msk [vmem:[%s934_s21 + $0x78] sm:$0xff] %vm545_vm3, %v544_v32 }
 0x122 PF: > { %s13_s14 = sadd.s32 1, %s816_s14   ;;  %s995_s12 = smov %s812_s13 }
 0x123   : > { %p10_p5 = scmp.ge.s32.totalorder %s13_s14, 18   ;;  %s996_s13 = smov %s998_s15 }
 0x125   :  { %12 = sbr.rel (!%p10_p5) target bundleno = 2 (0x2), region = 68 }

</bundles_post_ra>
